<compile_context>
chip_gen: v7x
topology: tpu7x:2x2x1
jax: 0.10.0
libtpu: 0.0.40
codegen_flags: <defaults>
</compile_context>

<pallas_src>
import jax
import jax.numpy as jnp
from jax.experimental import pallas as pl
from jax.experimental.pallas import tpu as pltpu

K_IN = 784          # input features (28*28); full-dim block, no K padding needed
H = 32              # hidden width
N_OUT = 10          # true output features
N_PAD = 128         # lane-dense padded output width


def _round_up(x, m):
    return ((x + m - 1) // m) * m


def fnn2_kernel(x_ref, w1_ref, b1_ref, w2_ref, b2_ref, out_ref):
    # x_ref : (TB, 784) f32     w1_ref: (784, 32) bf16   b1_ref: (1, 32)  f32
    # w2_ref: (32, 128) bf16    b2_ref: (1, 128)  f32    out   : (TB, 128) bf16
    x = x_ref[...].astype(jnp.bfloat16)                               # cast in VMEM, not HBM
    h = jnp.dot(x, w1_ref[...], preferred_element_type=jnp.float32)  # (TB, 32) f32 acc
    h = jnp.maximum(h + b1_ref[...], 0.0)                             # bias + ReLU in f32
    y = jnp.dot(h.astype(jnp.bfloat16), w2_ref[...],
                preferred_element_type=jnp.float32)                   # (TB, 128) f32 acc
    out_ref[...] = (y + b2_ref[...]).astype(out_ref.dtype)            # bf16 writeback


def fnn2_forward(x_nchw, w1, b1, w2, b2, *, tb=1024):
    """Pallas implementation of FNN_2.forward.

    x_nchw: (B, 1, 28, 28) f32 (anything flattening to (B, 784))
    w1: (784, 32), b1: (1, 32)-like, w2: (32, 10), b2: (1, 10)-like
    returns (y, y) with y: (B, 10) f32, matching the PyTorch module.
    """
    B = x_nchw.shape[0]
    x = x_nchw.reshape(B, K_IN).astype(jnp.float32)        # x.view(-1, 784); free reshape

    # Batch tile: multiple of 8 sublanes, capped at tb; ragged last tile via cdiv grid.
    TB = max(8, _round_up(min(int(tb), _round_up(B, 8)), 8))
    grid = (pl.cdiv(B, TB),)

    # Tiny, VMEM-resident operands (only these get padded/cast in the wrapper).
    w1_b = w1.astype(jnp.bfloat16)                                     # (784, 32)
    b1_f = b1.reshape(1, H).astype(jnp.float32)                        # (1, 32)
    w2_p = jnp.zeros((H, N_PAD), jnp.bfloat16).at[:, :N_OUT].set(w2.astype(jnp.bfloat16))
    b2_p = jnp.zeros((1, N_PAD), jnp.float32).at[:, :N_OUT].set(
        b2.reshape(1, N_OUT).astype(jnp.float32))

    flops = B * (2 * K_IN * H + 2 * H * N_PAD)
    bytes_accessed = (B * K_IN * 4            # x read (f32)
                      + K_IN * H * 2 + H * N_PAD * 2 + H * 4 + N_PAD * 4   # params
                      + B * N_PAD * 2)        # bf16 writeback

    y_pad = pl.pallas_call(
        fnn2_kernel,
        out_shape=jax.ShapeDtypeStruct((B, N_PAD), jnp.bfloat16),
        grid=grid,
        in_specs=[
            pl.BlockSpec((TB, K_IN), lambda i: (i, 0)),     # x: streamed per batch tile
            pl.BlockSpec((K_IN, H), lambda i: (0, 0)),      # w1: resident
            pl.BlockSpec((1, H), lambda i: (0, 0)),         # b1: resident
            pl.BlockSpec((H, N_PAD), lambda i: (0, 0)),     # w2: resident
            pl.BlockSpec((1, N_PAD), lambda i: (0, 0)),     # b2: resident
        ],
        out_specs=pl.BlockSpec((TB, N_PAD), lambda i: (i, 0)),
        compiler_params=pltpu.CompilerParams(
            dimension_semantics=("parallel",)),
        cost_estimate=pl.CostEstimate(
            flops=flops, transcendentals=0, bytes_accessed=bytes_accessed),
    )(x, w1_b, b1_f, w2_p, b2_p)

    y = y_pad[:, :N_OUT].astype(jnp.float32)   # tiny (B,10) slice + cast
    return (y, y)


def init_params(key):
    """Params matching nn.Linear(784,32) / nn.Linear(32,10) shapes
    (stored as (in, out) for row-major matmul)."""
    k1, k2, k3, k4 = jax.random.split(key, 4)
    bound1 = 1.0 / jnp.sqrt(784.0)
    bound2 = 1.0 / jnp.sqrt(32.0)
    w1 = jax.random.uniform(k1, (K_IN, H), jnp.float32, -bound1, bound1)
    b1 = jax.random.uniform(k2, (1, H), jnp.float32, -bound1, bound1)
    w2 = jax.random.uniform(k3, (H, N_OUT), jnp.float32, -bound2, bound2)
    b2 = jax.random.uniform(k4, (1, N_OUT), jnp.float32, -bound2, bound2)
    return w1, b1, w2, b2


def _reference(x_nchw, w1, b1, w2, b2):
    B = x_nchw.shape[0]
    xf = x_nchw.reshape(B, K_IN)
    h = jnp.maximum(xf @ w1 + b1, 0.0)
    return h @ w2 + b2


if __name__ == "__main__":
    key = jax.random.PRNGKey(0)
    kx, kp, kx2 = jax.random.split(key, 3)
    w1, b1, w2, b2 = init_params(kp)

    # Small case (B=2): single (ragged) tile.
    B = 2
    x = jax.random.normal(kx, (B, 1, 28, 28), jnp.float32)
    y1, y2 = fnn2_forward(x, w1, b1, w2, b2)
    jax.block_until_ready((y1, y2))
    yref = _reference(x, w1, b1, w2, b2)
    assert y1.shape == (B, N_OUT) and y2.shape == (B, N_OUT)
    # bf16 MXU inputs + bf16 writeback (f32 accumulation) -> looser tolerance than f32.
    assert jnp.allclose(y1, yref, atol=3e-2, rtol=3e-2)
    assert jnp.allclose(y2, yref, atol=3e-2, rtol=3e-2)

    # Multi-tile + ragged-last-tile case: B=300 with tb=128 -> grid=(3,), last tile = 44 rows.
    B2 = 300
    x2 = jax.random.normal(kx2, (B2, 1, 28, 28), jnp.float32)
    z1, z2 = fnn2_forward(x2, w1, b1, w2, b2, tb=128)
    jax.block_until_ready((z1, z2))
    zref = _reference(x2, w1, b1, w2, b2)
    assert z1.shape == (B2, N_OUT)
    assert jnp.allclose(z1, zref, atol=3e-2, rtol=3e-2)
    assert jnp.allclose(z2, zref, atol=3e-2, rtol=3e-2)

    print("KERNEL_OK")
</pallas_src>

<mosaic_0001>
module attributes {stable_mosaic.version = 11 : i64} {
  func.func @fnn2_kernel(%arg0: i32, %arg1: memref<8x784xf32, #tpu.memory_space<vmem>>, %arg2: memref<784x32xbf16, #tpu.memory_space<vmem>>, %arg3: memref<1x32xf32, #tpu.memory_space<vmem>>, %arg4: memref<32x128xbf16, #tpu.memory_space<vmem>>, %arg5: memref<1x128xf32, #tpu.memory_space<vmem>>, %arg6: memref<8x128xbf16, #tpu.memory_space<vmem>>) attributes {dimension_semantics = [#tpu.dimension_semantics<parallel>], iteration_bounds = array<i64: 1>, scalar_prefetch = 0 : i64, scratch_operands = 0 : i64, tpu.core_type = #tpu.core_type<tc>, window_params = [{transform_indices = @transform_0, window_bounds = array<i64: 8, 784>}, {pipeline_mode = #tpu.pipeline_mode<synchronous>, transform_indices = @transform_1, window_bounds = array<i64: 784, 32>}, {pipeline_mode = #tpu.pipeline_mode<synchronous>, transform_indices = @transform_2, window_bounds = array<i64: 1, 32>}, {pipeline_mode = #tpu.pipeline_mode<synchronous>, transform_indices = @transform_3, window_bounds = array<i64: 32, 128>}, {pipeline_mode = #tpu.pipeline_mode<synchronous>, transform_indices = @transform_4, window_bounds = array<i64: 1, 128>}, {transform_indices = @transform_5, window_bounds = array<i64: 8, 128>}]} {
    %c0 = arith.constant 0 : index
    %c0_0 = arith.constant 0 : index
    %0 = vector.load %arg1[%c0, %c0_0] : memref<8x784xf32, #tpu.memory_space<vmem>>, vector<8x784xf32>
    %1 = arith.truncf %0 : vector<8x784xf32> to vector<8x784xbf16>
    %c0_1 = arith.constant 0 : index
    %c0_2 = arith.constant 0 : index
    %2 = vector.load %arg2[%c0_1, %c0_2] : memref<784x32xbf16, #tpu.memory_space<vmem>>, vector<784x32xbf16>
    %cst = arith.constant dense<0.000000e+00> : vector<8x32xf32>
    %3 = tpu.matmul %1, %2, %cst {dimension_numbers = #tpu.dot_dimension_numbers<[1], [0], [0], [1], [0, 0, 1, 1], [], []>} : vector<8x784xbf16>, vector<784x32xbf16>, vector<8x32xf32> -> vector<8x32xf32>
    %c0_3 = arith.constant 0 : index
    %c0_4 = arith.constant 0 : index
    %4 = vector.load %arg3[%c0_3, %c0_4] : memref<1x32xf32, #tpu.memory_space<vmem>>, vector<1x32xf32>
    %5 = vector.broadcast %4 : vector<1x32xf32> to vector<8x32xf32>
    %6 = arith.addf %3, %5 : vector<8x32xf32>
    %cst_5 = arith.constant 0.000000e+00 : f32
    %7 = vector.broadcast %cst_5 : f32 to vector<8x32xf32>
    %8 = arith.maximumf %6, %7 : vector<8x32xf32>
    %9 = arith.truncf %8 : vector<8x32xf32> to vector<8x32xbf16>
    %c0_6 = arith.constant 0 : index
    %c0_7 = arith.constant 0 : index
    %10 = vector.load %arg4[%c0_6, %c0_7] : memref<32x128xbf16, #tpu.memory_space<vmem>>, vector<32x128xbf16>
    %cst_8 = arith.constant dense<0.000000e+00> : vector<8x128xf32>
    %11 = tpu.matmul %9, %10, %cst_8 {dimension_numbers = #tpu.dot_dimension_numbers<[1], [0], [0], [1], [0, 0, 1, 1], [], []>} : vector<8x32xbf16>, vector<32x128xbf16>, vector<8x128xf32> -> vector<8x128xf32>
    %c0_9 = arith.constant 0 : index
    %c0_10 = arith.constant 0 : index
    %12 = vector.load %arg5[%c0_9, %c0_10] : memref<1x128xf32, #tpu.memory_space<vmem>>, vector<1x128xf32>
    %13 = vector.broadcast %12 : vector<1x128xf32> to vector<8x128xf32>
    %14 = arith.addf %11, %13 : vector<8x128xf32>
    %15 = arith.truncf %14 : vector<8x128xf32> to vector<8x128xbf16>
    %c0_11 = arith.constant 0 : index
    %c0_12 = arith.constant 0 : index
    %16 = vector.load %arg6[%c0_11, %c0_12] : memref<8x128xbf16, #tpu.memory_space<vmem>>, vector<8x128xbf16>
    tpu.vector_store %arg6[%c0_11, %c0_12], %15 {strides = array<i32>} : memref<8x128xbf16, #tpu.memory_space<vmem>>, vector<8x128xbf16>,
    return
  }
  func.func @transform_0(%arg0: i32) -> (i32, i32) {
    %c0_i32 = arith.constant 0 : i32
    %c0_i32_0 = arith.constant 0 : i32
    return %arg0, %c0_i32 : i32, i32
  }
  func.func @transform_1(%arg0: i32) -> (i32, i32) {
    %c0_i32 = arith.constant 0 : i32
    %c0_i32_0 = arith.constant 0 : i32
    %c0_i32_1 = arith.constant 0 : i32
    return %c0_i32, %c0_i32_0 : i32, i32
  }
  func.func @transform_2(%arg0: i32) -> (i32, i32) {
    %c0_i32 = arith.constant 0 : i32
    %c0_i32_0 = arith.constant 0 : i32
    %c0_i32_1 = arith.constant 0 : i32
    return %c0_i32, %c0_i32_0 : i32, i32
  }
  func.func @transform_3(%arg0: i32) -> (i32, i32) {
    %c0_i32 = arith.constant 0 : i32
    %c0_i32_0 = arith.constant 0 : i32
    %c0_i32_1 = arith.constant 0 : i32
    return %c0_i32, %c0_i32_0 : i32, i32
  }
  func.func @transform_4(%arg0: i32) -> (i32, i32) {
    %c0_i32 = arith.constant 0 : i32
    %c0_i32_0 = arith.constant 0 : i32
    %c0_i32_1 = arith.constant 0 : i32
    return %c0_i32, %c0_i32_0 : i32, i32
  }
  func.func @transform_5(%arg0: i32) -> (i32, i32) {
    %c0_i32 = arith.constant 0 : i32
    %c0_i32_0 = arith.constant 0 : i32
    return %arg0, %c0_i32 : i32, i32
  }
}

</mosaic_0001>

<bundles_post_ra>
// kernel: tpu_custom_call.1
= control target key start
LH: loop header
LB: loop body
LE: loop exit
PB: predicated region body
PF: predicated region fallthrough
CT: control target
= control target key end

     0   :  { %10 = vsyncpa [#allocation3], 0  ;;  %v45_v28 = vlaneseq  ;;  %v1041_v33 = vmov 1983009808   ;;  %v1042_v43 = vmov 0.0   ;;  %vm1043_vm0 = vmmov 0   ;;  %s1284_s0 = inlined_call_operand.vmem [shape: f32[2,784], index: 0, kind: input, shape index: {}]   ;;  %s1285_s1 = inlined_call_operand.vmem [shape: bf16[784,32], index: 1, kind: input, shape index: {}]   ;;  %s1286_s2 = inlined_call_operand.vmem [shape: f32[1,32], index: 2, kind: input, shape index: {}]   ;;  %s1287_s3 = inlined_call_operand.vmem [shape: bf16[32,128], index: 3, kind: input, shape index: {}]   ;;  %s1288_s4 = inlined_call_operand.vmem [shape: f32[1,128], index: 4, kind: input, shape index: {}]   ;;  %s1289_s5 = inlined_call_operand.hbm [shape: bf16[2,128], index: 5, kind: output, shape index: {}]  }
   0x1   :  { %v954_v0 = vld [vmem:[%s1285_s1 + $0x40] sm:$0xff]   ;;  %v958_v4 = vld [vmem:[%s1285_s1 + $0x48] sm:$0xff]   ;;  %v962_v8 = vld [vmem:[%s1285_s1 + $0x50] sm:$0xff]   ;;  %v43_v34 = vunpack.c.l.s4 %v1041_v33  ;;  %vm522_vm1 = vcmask 130048   ;;  %vm711_vm2 = vcmask 261120  }
   0x2   :  { %v955_v1 = vld [vmem:[%s1285_s1] sm:$0xff]   ;;  %862 = vmatprep.subr.bf16.mxu0 %v954_v0  ;;  %v959_v5 = vld [vmem:[%s1285_s1 + $0x8] sm:$0xff]   ;;  %v963_v9 = vld [vmem:[%s1285_s1 + $0x10] sm:$0xff]   ;;  %v1174_v35 = vshrl.u32 %v45_v28, 7 }
   0x3   :  { %v956_v2 = vld [vmem:[%s1285_s1 + $0xc0] sm:$0xff]   ;;  %863 = vmatpush3.bf16.msra.mxu0 %v955_v1  ;;  %v960_v6 = vld [vmem:[%s1285_s1 + $0xc8] sm:$0xff]   ;;  %v964_v10 = vld [vmem:[%s1285_s1 + $0xd0] sm:$0xff]   ;;  %v44_v37 = vunpack.c.0.s8 %v43_v34 }
   0x4   :  { %v957_v3 = vld [vmem:[%s1285_s1 + $0x80] sm:$0xff]   ;;  %884 = vmatprep.subr.bf16.mxu1 %v956_v2  ;;  %864 = vmatprep.subr.bf16.mxu0 %v958_v4  ;;  %v961_v7 = vld [vmem:[%s1285_s1 + $0x88] sm:$0xff]   ;;  %v965_v11 = vld [vmem:[%s1285_s1 + $0x90] sm:$0xff]  }
   0x5   :  { %885 = vmatpush3.bf16.msra.mxu1 %v957_v3  ;;  %v966_v12 = vld [vmem:[%s1285_s1 + $0x58] sm:$0xff]   ;;  %v970_v16 = vld [vmem:[%s1285_s1 + $0x60] sm:$0xff]   ;;  %v974_v20 = vld [vmem:[%s1285_s1 + $0x68] sm:$0xff]   ;;  %v47_v42 = vsub.s32 %v44_v37, %v1174_v35 }
   0x6   :  { %886 = vmatprep.subr.bf16.mxu1 %v960_v6  ;;  %v967_v13 = vld [vmem:[%s1285_s1 + $0x18] sm:$0xff]   ;;  %v971_v17 = vld [vmem:[%s1285_s1 + $0x20] sm:$0xff]   ;;  %v975_v21 = vld [vmem:[%s1285_s1 + $0x28] sm:$0xff]  }
   0x7   :  { %865 = vmatpush3.bf16.msra.mxu0 %v959_v5  ;;  %v968_v14 = vld [vmem:[%s1285_s1 + $0xd8] sm:$0xff]   ;;  %v972_v18 = vld [vmem:[%s1285_s1 + $0xe0] sm:$0xff]   ;;  %v976_v22 = vld [vmem:[%s1285_s1 + $0xe8] sm:$0xff]  }
   0x8   :  { %866 = vmatprep.subr.bf16.mxu0 %v962_v8  ;;  %v969_v15 = vld [vmem:[%s1285_s1 + $0x98] sm:$0xff]   ;;  %v973_v19 = vld [vmem:[%s1285_s1 + $0xa0] sm:$0xff]   ;;  %v977_v23 = vld [vmem:[%s1285_s1 + $0xa8] sm:$0xff]  }
   0x9   :  { %887 = vmatpush3.bf16.msra.mxu1 %v961_v7  ;;  %v978_v24 = vld [vmem:[%s1285_s1 + $0x70] sm:$0xff]   ;;  %v982_v29 = vld [vmem:[%s1285_s1 + $0x78] sm:$0xff]   ;;  %v990_v39 = vld [vmem:[%s1285_s1 + $0x140] sm:$0xff]  }
   0xa   :  { %888 = vmatprep.subr.bf16.mxu1 %v964_v10  ;;  %v979_v25 = vld [vmem:[%s1285_s1 + $0x30] sm:$0xff]   ;;  %v983_v30 = vld [vmem:[%s1285_s1 + $0x38] sm:$0xff]   ;;  %v993_v55 = vld [vmem:[%s1285_s1 + $0x100] sm:$0xff]  }
   0xb   :  { %867 = vmatpush3.bf16.msra.mxu0 %v963_v9  ;;  %v980_v26 = vld [vmem:[%s1285_s1 + $0xf0] sm:$0xff]   ;;  %v984_v31 = vld [vmem:[%s1285_s1 + $0xf8] sm:$0xff]   ;;  %v994_v57 = vld [vmem:[%s1285_s1 + $0x148] sm:$0xff]  }
   0xc   :  { %868 = vmatprep.subr.bf16.mxu0 %v966_v12  ;;  %v981_v27 = vld [vmem:[%s1285_s1 + $0xb0] sm:$0xff]   ;;  %v987_v36 = vld [vmem:[%s1284_s0 + $0x1c] ss:$14 sps:$4 sm:$0xff]   ;;  %v1008_v62 = vld [vmem:[%s1285_s1 + $0x180] sm:$0xff]  }
   0xd   :  { %889 = vmatpush3.bf16.msra.mxu1 %v965_v11  ;;  %v985_v32 = vld [vmem:[%s1284_s0] ss:$14 sps:$4 sm:$0xff]   ;;  %v989_v38 = vld [vmem:[%s1285_s1 + $0xb8] sm:$0xff]   ;;  %v991_v40 = vld [vmem:[%s1284_s0 + $0x4] ss:$14 sps:$4 sm:$0xff]   ;;  %v62_v45 = vrot.slane %v987_v36, %v47_v42 }
   0xe   :  { %890 = vmatprep.subr.bf16.mxu1 %v968_v14  ;;  %v992_v41 = vld [vmem:[%s1284_s0 + $0x20] ss:$14 sps:$4 sm:$0xff]   ;;  %v48_v44 = vrot.slane %v985_v32, %v47_v42  ;;  %v55_v46 = vrot.slane %v991_v40, %v47_v42  ;;  %v998_v61 = vld [vmem:[%s1285_s1 + $0x158] sm:$0xff]   ;;  %v1012_v2 = vld [vmem:[%s1284_s0 + $0x24] ss:$14 sps:$4 sm:$0xff]  }
   0xf   :  { %869 = vmatpush3.bf16.msra.mxu0 %v967_v13  ;;  %v69_v47 = vrot.slane %v992_v41, %v47_v42  ;;  %v995_v58 = vld [vmem:[%s1285_s1 + $0x108] sm:$0xff]   ;;  %v996_v59 = vld [vmem:[%s1285_s1 + $0x150] sm:$0xff]   ;;  %v999_v63 = vld [vmem:[%s1285_s1 + $0x118] sm:$0xff]   ;;  %v98_v6 = vrot.slane %v1012_v2, %v47_v42 }
  0x10   :  { %870 = vmatprep.subr.bf16.mxu0 %v970_v16  ;;  %v71_v48 = vcombine.high %v48_v44, %v62_v45  ;;  %v70_v49 = vcombine.low %v48_v44, %v62_v45  ;;  %v997_v60 = vld [vmem:[%s1285_s1 + $0x110] sm:$0xff]   ;;  %v1000_v0 = vld [vmem:[%s1285_s1 + $0x160] sm:$0xff]   ;;  %v1011_v3 = vld [vmem:[%s1284_s0 + $0xc] ss:$14 sps:$4 sm:$0x33]  }
  0x11   :  { %891 = vmatpush3.bf16.msra.mxu1 %v969_v15  ;;  %v73_v50 = vcombine.high %v55_v46, %v69_v47  ;;  %v72_v51 = vcombine.low %v55_v46, %v69_v47  ;;  %v1009_v1 = vld [vmem:[%s1284_s0 + $0x8] ss:$14 sps:$4 sm:$0xff]   ;;  %v91_v7 = vrot.slane %v1011_v3, %v47_v42  ;;  %v1001_v10 = vld [vmem:[%s1285_s1 + $0x120] sm:$0xff]  }
  0x12   :  { %892 = vmatprep.subr.bf16.mxu1 %v972_v18  ;;  %v117_v52 = vpack.c.bf16 %v71_v48, %v71_v48  ;;  %v116_v53 = vpack.c.bf16 %v70_v49, %v70_v49  ;;  %v1014_v4 = vld [vmem:[%s1284_s0 + $0x28] ss:$14 sps:$4 sm:$0x33]   ;;  %v84_v5 = vrot.slane %v1009_v1, %v47_v42  ;;  %v1006_v18 = vld [vmem:[%s1285_s1 + $0x178] sm:$0xff]  }
  0x13   :  { %871 = vmatpush3.bf16.msra.mxu0 %v971_v17  ;;  %v119_v54 = vpack.c.bf16 %v73_v50, %v73_v50  ;;  %v118_v56 = vpack.c.bf16 %v72_v51, %v72_v51  ;;  %v105_v8 = vrot.slane %v1014_v4, %v47_v42  ;;  %v1002_v12 = vld [vmem:[%s1285_s1 + $0x168] sm:$0xff]   ;;  %v1004_v16 = vld [vmem:[%s1285_s1 + $0x170] sm:$0xff]   ;;  %v1044_v51 = vmov 1966171168  }
  0x14   :  { %872 = vmatprep.subr.bf16.mxu0 %v974_v20  ;;  %558 = vmatprep.mubr.bf16.mxu0 %v117_v52  ;;  %v107_v9 = vcombine.high %v84_v5, %v98_v6  ;;  %v1003_v15 = vld [vmem:[%s1285_s1 + $0x128] sm:$0xff]   ;;  %v1005_v17 = vld [vmem:[%s1285_s1 + $0x130] sm:$0xff]   ;;  %v1007_v20 = vld [vmem:[%s1285_s1 + $0x138] sm:$0xff]   ;;  %v758_v52 = vunpack.c.l.s4 %v1044_v51 }
  0x15   :  { %893 = vmatpush3.bf16.msra.mxu1 %v973_v19  ;;  %598 = vmatprep.mubr.bf16.mxu1 %v119_v54  ;;  %v108_v11 = vcombine.low %v91_v7, %v105_v8  ;;  %v106_v19 = vcombine.low %v84_v5, %v98_v6  ;;  %v856_v54 = vld [vmem:[%s1288_s4] ss:$0 sm:$0xff] }
  0x16   :  { %894 = vmatprep.subr.bf16.mxu1 %v976_v22  ;;  %v121_v13 = vpack.c.bf16 %v107_v9, %v107_v9  ;;  %v1015_v22 = vld [vmem:[%s1287_s3] sm:$0xff]  }
  0x17   :  { %873 = vmatpush3.bf16.msra.mxu0 %v975_v21  ;;  %v122_v14 = vpack.c.bf16 %v108_v11, %v108_v11  ;;  %v120_v21 = vpack.c.bf16 %v106_v19, %v106_v19 }
  0x18   :  { %874 = vmatprep.subr.bf16.mxu0 %v978_v24 }
  0x19   :  { %895 = vmatpush3.bf16.msra.mxu1 %v977_v23  ;;  %v1016_v23 = vld [vmem:[%s1287_s3 + $0x8] sm:$0xff]  }
  0x1a   :  { %896 = vmatprep.subr.bf16.mxu1 %v980_v26  ;;  %v805_v26 = vld [vmem:[%s1286_s2] ss:$0 sm:$0xff] }
  0x1b   :  { %875 = vmatpush3.bf16.msra.mxu0 %v979_v25 }
  0x1c   :  { %876 = vmatprep.subr.bf16.mxu0 %v982_v29 }
  0x1d   :  { %897 = vmatpush3.bf16.msra.mxu1 %v981_v27 }
  0x1e   :  { %898 = vmatprep.subr.bf16.mxu1 %v984_v31 }
  0x1f   :  { %877 = vmatpush3.bf16.msra.mxu0 %v983_v30 }
  0x20   :  { %906 = vmatprep.subr.bf16.mxu0 %v990_v39 }
  0x21   :  { %899 = vmatpush3.bf16.msra.mxu1 %v989_v38 }
  0x22   :  { %933 = vmatprep.subr.bf16.mxu1 %v1042_v43  ;;  %559 = vmatmul.mubr.bf16.vlgmr.msra.gmra.mrb[0].mxu0 %v116_v53  ;;  %v759_v53 = vunpack.c.0.s8 %v758_v52 }
  0x23   :  { %907 = vmatpush3.bf16.msra.mxu0 %v993_v55  ;;  %638 = vmatprep.mubr.bf16.mxu0 %v121_v13 }
  0x24   :  { %599 = vmatmul.mubr.bf16.vlgmr.msra.gmra.mrb[0].mxu1 %v118_v56  ;;  %908 = vmatprep.subr.bf16.mxu0 %v994_v57  ;;  %v762_v57 = vsub.s32 %v759_v53, %v1174_v35 }
  0x25   :  { %935 = vmatprep.mubr.msk.bf16.mxu1 %vm1043_vm0, %v1042_v43  ;;  %934 = vmatpush3.bf16.msra.mxu1 %v1008_v62 }
  0x26   :  { %939 = vmatprep.subr.bf16.mxu1 %v1042_v43 }
  0x27   :  { %909 = vmatpush3.bf16.msra.mxu0 %v995_v58 }
  0x28   :  { %910 = vmatprep.subr.bf16.mxu0 %v996_v59 }
  0x2b   :  { %911 = vmatpush3.bf16.msra.mxu0 %v997_v60 }
  0x2c   :  { %912 = vmatprep.subr.bf16.mxu0 %v998_v61  ;;  %936 = vmatmul.mubr.msk.bf16.vlgmr.msra.gmra.mrb[4].mxu1 %vm522_vm1, %v122_v14 }
  0x2d   :  { %943 = vmatprep.mubr.msk.bf16.mxu1 %vm1043_vm0, %v1042_v43  ;;  %940 = vmatpush3.bf16.msra.mxu1 %v1015_v22 }
  0x2e   :  { %941 = vmatprep.subr.bf16.mxu1 %v1042_v43 }
  0x2f   :  { %913 = vmatpush3.bf16.msra.mxu0 %v999_v63 }
  0x30   :  { %914 = vmatprep.subr.bf16.mxu0 %v1000_v0 }
  0x31   :  { %942 = vmatpush3.bf16.msra.mxu1 %v1016_v23 }
  0x33   :  { %915 = vmatpush3.bf16.msra.mxu0 %v1001_v10 }
  0x34   :  { %916 = vmatprep.subr.bf16.mxu0 %v1002_v12 }
  0x37   :  { %917 = vmatpush3.bf16.msra.mxu0 %v1003_v15 }
  0x38   :  { %918 = vmatprep.subr.bf16.mxu0 %v1004_v16 }
  0x3b   :  { %919 = vmatpush3.bf16.msra.mxu0 %v1005_v17 }
  0x3c   :  { %920 = vmatprep.subr.bf16.mxu0 %v1006_v18 }
  0x3f   :  { %921 = vmatpush3.bf16.msra.mxu0 %v1007_v20 }
  0x42   :  { %639 = vmatmul.mubr.bf16.vlgmr.msra.gmra.mrb[4].mxu0 %v120_v21 }
  0xf5   :  { %v878_v24 = vpop.f32.mrb[0].mxu0 }
  0xf6   :  { %v879_v27 = vpop.f32.mrb[1].mxu0 }
  0xf7   :  { %v900_v25 = vpop.f32.mrb[0].mxu1  ;;  %v880_v29 = vadd.f32 %v879_v27, %v878_v24  ;;  %v881_v30 = vpop.f32.mrb[2].mxu0 }
  0xf8   :  { %v901_v28 = vpop.f32.mrb[1].mxu1  ;;  %v882_v33 = vpop.f32.mrb[3].mxu0 }
  0xf9   :  { %v902_v31 = vadd.f32 %v901_v28, %v900_v25  ;;  %v903_v32 = vpop.f32.mrb[2].mxu1  ;;  %v561_v36 = vadd.f32 %v880_v29, %v805_v26 }
  0xfa   :  { %v904_v34 = vpop.f32.mrb[3].mxu1 }
  0xfb   :  { %v601_v37 = vadd.f32 %v902_v31, %v561_v36 }
  0xff   :  { %v680_v38 = vpop.f32.mrb[4].mxu1 }
 0x100   :  { %v937_v39 = vpop.f32.mrb[5].mxu1 }
 0x101   :  { %v683_v40 = vpop.f32.mrb[6].mxu1 }
 0x102   :  { %v938_v41 = vpop.f32.mrb[7].mxu1 }
 0x115   :  { %v922_v42 = vpop.f32.mrb[4].mxu0 }
 0x116   :  { %v923_v43 = vpop.f32.mrb[5].mxu0 }
 0x117   :  { %v924_v44 = vadd.f32 %v923_v43, %v922_v42  ;;  %v925_v45 = vpop.f32.mrb[6].mxu0 }
 0x118   :  { %v926_v46 = vpop.f32.mrb[7].mxu0 }
 0x119   :  { %v641_v47 = vadd.f32 %v924_v44, %v601_v37 }
 0x11b   :  { %v681_v48 = vadd.f32 %v680_v38, %v641_v47 }
 0x11d   :  { %v686_v49 = vmax.f32 %v681_v48, 0.0 }
 0x11f   :  { %v687_v50 = vpack.c.bf16 %v686_v49, %v686_v49 }
 0x121   :  { %944 = vmatmul.mubr.msk.bf16.vlgmr.msra.gmra.mrb[8].mxu1 %vm711_vm2, %v687_v50 }
 0x1f4   :  { %v749_v55 = vpop.f32.mrb[8].mxu1 }
 0x1f5   :  { %v750_v56 = vadd.f32 %v856_v54, %v749_v55  ;;  %v945_v58 = vpop.f32.mrb[9].mxu1 }
 0x1f6   :  { %v752_v59 = vpop.f32.mrb[10].mxu1 }
 0x1f7   :  { %v755_v60 = vpack.c.bf16 %v750_v56, %v750_v56  ;;  %v946_v61 = vpop.f32.mrb[11].mxu1 }
 0x1f9   :  { %v763_v62 = vrot.slane %v755_v60, %v762_v57 }
 0x1fb   :  { %v764_v63 = vcombine.high %v763_v62, %v763_v62  ;;  %v771_v0 = vrot.slane %v763_v62, %v762_v57  ;;  %860 = vst.sshfl [vmem:[#allocation2] sm:$0x1 pattern:$0x73625140] %v763_v62 }
 0x1fd   :  { %v778_v1 = vrot.slane %v764_v63, %v762_v57  ;;  %v779_v2 = vcombine.high %v771_v0, %v771_v0  ;;  %861 = vst.sshfl [vmem:[#allocation2 + $0x1] sm:$0x1 pattern:$0x73625140] %v764_v63 }
 0x1ff   :  { %v780_v3 = vcombine.high %v778_v1, %v778_v1  ;;  %787 = vst [vmem:[#allocation2 + $0x2] sm:$0x1] %v779_v2 }
 0x201   :  { %788 = vst [vmem:[#allocation2 + $0x3] sm:$0x1] %v780_v3 }
 0x202   :  { %793 = vsyncadd [#allocation3], 48  ;;  %s1045_s4 = smov [#allocation2]  }
 0x203   :  { %s794_s11 = sshll.u32 %s1045_s4, 4  ;;  %s795_s11 = int_to_ptr.vmem [resolvable:$true] %s794_s11 }
 0x204   :  { %s1017_s12 = scalar_lea.vmem %s795_s11, 16  ;;  %s1021_s13 = scalar_lea.vmem %s795_s11, 64 }
 0x205   :  { %p1018_p0 = scmp.ne.s32.totalorder %s795_s11, %s1017_s12  ;;  %p1022_p1 = scmp.lt.s32.totalorder %s795_s11, %s795_s11 }
 0x206   :  { %p1023_p2 = scmp.lt.s32.totalorder %s1021_s13, %s1017_s12 }
 0x208   :  { %p1024_p3 = por %p1023_p2, %p1022_p1 }
 0x20a   :  { %p1025_p4 = pnand %p1024_p3, %p1018_p0 }
 0x20c   :  { %1028 = shalt.err (!%p1025_p4)
}
 0x20d   :  { %s1029_s16 = scalar_lea.hbm %s1289_s5, 16 }
 0x20e   :  { %p1030_p5 = scmp.ne.s32.totalorder %s1289_s5, %s1029_s16  ;;  %p1033_p6 = scmp.lt.u32.totalorder %s1029_s16, %s1289_s5 }
 0x210   :  { %p1035_p7 = pnand %p1033_p6, %p1030_p5 }
 0x212   :  { %1038 = shalt.err (!%p1035_p7)
}
 0x213   :  { %s1046_s21 = smov 16   ;;  %s1047_s0 = smov 1  }
 0x214   :  { %800 = dma.vmem_to_hbm [thread:$0]  %s795_s11, 16, %s1289_s5, [#allocation3], %s1046_s21, %s1046_s21, %s1047_s0  }
 0x215   :  { %1039 = dma.done.wait [#allocation3], 64  }
 0x216   :  { %1040 = vsyncadd [#allocation3], 4294967232 }
 0x217   :  { %804 = vsyncpa [#allocation3], 1 }

</bundles_post_ra>
